<compile_context>
chip_gen: v5e
topology: v5e:2x2
jax: 0.10.0
libtpu: 0.0.40
codegen_flags: <defaults>
</compile_context>

<pallas_src>
import functools

import jax
import jax.numpy as jnp
from jax import lax
from jax.experimental import pallas as pl
from jax.experimental.pallas import tpu as pltpu


def _basic_block_kernel(x_ref, m1_ref, g1_ref, b1_ref, m2_ref, g2_ref, b2_ref,
                        fold_ref, foldt_ref, out_ref, *, n, h, w, c, eps):
    """Whole BasicBlock forward on lane-dense slabs resident in VMEM.

    x_ref    : (n*h, w*c)   f32 input slab (row = n*h + h_idx, col = w_idx*c + ch)
    m*_ref   : (3*w*c, w*c) bf16 block-Toeplitz conv weights (width pad folded in;
                            rows [ky*w*c:(ky+1)*w*c] correspond to kernel row ky)
    g*/b*    : (1, c)       f32 BN gamma / beta
    fold_ref : (w*c, c)     bf16 0/1 column -> channel fold matrix
    foldt_ref: (c, w*c)     bf16 0/1 channel -> column broadcast matrix
    out_ref  : (n*h, w*c)   f32
    """
    wc = w * c
    inv_cnt = 1.0 / float(n * h * w)

    x2d = x_ref[...]                                   # (n*h, wc) f32 (residual)
    xb = x2d.astype(jnp.bfloat16)                      # bf16-early for the MXU
    zrow = jnp.zeros((n, 1, wc), jnp.float32)
    fold_f = fold_ref[...].astype(jnp.float32)         # (wc, c), 0/1 exact
    foldt_f = foldt_ref[...].astype(jnp.float32)       # (c, wc)

    def conv3x3(xb2d, m_ref):
        """3x3 conv, stride 1, pad 1: 3 bf16 matmuls (one per dy), f32 accumulate.

        Row shifts (dy = -1 / +1) are applied on the f32 outputs via zero-fill
        sublane concatenation; no widened input slab is materialized.
        """
        up = jnp.dot(xb2d, m_ref[pl.ds(0, wc), :],
                     preferred_element_type=jnp.float32)       # ky=0: reads row h-1
        mid = jnp.dot(xb2d, m_ref[pl.ds(wc, wc), :],
                      preferred_element_type=jnp.float32)      # ky=1: same row
        dn = jnp.dot(xb2d, m_ref[pl.ds(2 * wc, wc), :],
                     preferred_element_type=jnp.float32)       # ky=2: reads row h+1
        up3 = up.reshape(n, h, wc)
        dn3 = dn.reshape(n, h, wc)
        acc3 = (mid.reshape(n, h, wc)
                + jnp.concatenate([zrow, up3[:, :h - 1, :]], axis=1)   # shift down
                + jnp.concatenate([dn3[:, 1:, :], zrow], axis=1))      # shift up
        return acc3.reshape(n * h, wc)

    def bn_scale_bias(acc, g_ref, b_ref):
        """Training-mode BN folded into per-column scale / shift rows.

        One stacked (2, wc)@(wc, c) fold matmul and one stacked (2, c)@(c, wc)
        broadcast matmul.
        """
        stats = jnp.concatenate(
            [jnp.sum(acc, axis=0, keepdims=True),
             jnp.sum(acc * acc, axis=0, keepdims=True)], axis=0)        # (2, wc)
        ch = jnp.dot(stats, fold_f, preferred_element_type=jnp.float32)  # (2, c)
        mean = ch[0:1, :] * inv_cnt
        var = ch[1:2, :] * inv_cnt - mean * mean                         # biased
        scale = g_ref[...] * lax.rsqrt(var + eps)                        # (1, c)
        shift = b_ref[...] - mean * scale                                # (1, c)
        rows = jnp.dot(jnp.concatenate([scale, shift], axis=0), foldt_f,
                       preferred_element_type=jnp.float32)               # (2, wc)
        return rows[0:1, :], rows[1:2, :]

    # ---- conv1 -> bn1 -> relu ----
    acc1 = conv3x3(xb, m1_ref)                                  # (n*h, wc) f32
    sc1, sh1 = bn_scale_bias(acc1, g1_ref, b1_ref)
    y = jnp.maximum(acc1 * sc1 + sh1, 0.0)

    # ---- conv2 -> bn2 ----
    acc2 = conv3x3(y.astype(jnp.bfloat16), m2_ref)
    sc2, sh2 = bn_scale_bias(acc2, g2_ref, b2_ref)

    # ---- residual add (stride=1, downsample=None -> residual = x) + relu ----
    out_ref[...] = jnp.maximum(acc2 * sc2 + sh2 + x2d, 0.0)


def conv_to_toeplitz(w_hwio, width):
    """(3,3,Cin,Cout) HWIO -> (3*width*Cin, width*Cout) block-Toeplitz matrix.

    Row index = ky*(width*Cin) + wq*Cin + ci ; col index = wo*Cout + co ;
    entry = W[ky, wq - wo + 1, ci, co] when that dx is in [0,3), else 0.
    Width padding (pad=1) is folded into the band structure.
    """
    kh, kw, cin, cout = w_hwio.shape
    wq = jnp.arange(width)[:, None]                 # source column
    wo = jnp.arange(width)[None, :]                 # output column
    dx = wq - wo + 1                                # (width, width)
    valid = (dx >= 0) & (dx < kw)
    dxc = jnp.clip(dx, 0, kw - 1)
    t = w_hwio[:, dxc]                              # (kh, width, width, cin, cout)
    t = jnp.where(valid[None, :, :, None, None], t, 0.0)
    t = jnp.transpose(t, (0, 1, 3, 2, 4))           # (kh, wq, cin, wo, cout)
    return t.reshape(kh * width * cin, width * cout)


def prepare_basic_block_params(w1, g1, b1, w2, g2, b2, width):
    """One-time weight prep (hoisted out of the per-call path)."""
    C = w1.shape[2]
    assert w1.shape == (3, 3, C, C) and w2.shape == (3, 3, C, C), \
        "stride=1 BasicBlock needs Cin == Cout"
    m1 = conv_to_toeplitz(jnp.asarray(w1, jnp.float32), width).astype(jnp.bfloat16)
    m2 = conv_to_toeplitz(jnp.asarray(w2, jnp.float32), width).astype(jnp.bfloat16)
    eye = jnp.eye(C, dtype=jnp.float32)
    fold = jnp.tile(eye, (width, 1)).astype(jnp.bfloat16)      # (W*C, C), 0/1 exact
    return dict(
        m1=m1, m2=m2,
        g1=jnp.asarray(g1, jnp.float32).reshape(1, C),
        b1=jnp.asarray(b1, jnp.float32).reshape(1, C),
        g2=jnp.asarray(g2, jnp.float32).reshape(1, C),
        b2=jnp.asarray(b2, jnp.float32).reshape(1, C),
        fold=fold,
        foldt=jnp.transpose(fold),                             # (C, W*C)
    )


def _vmem_limit_bytes():
    """Per-generation VMEM scoped limit: leave headroom on 64-MiB chips (v7x)."""
    cap = 64 * 1024 * 1024
    try:
        info = pltpu.get_tpu_info()
        cap = int(getattr(info, "vmem_capacity_bytes", cap))
    except Exception:
        pass
    if cap <= 64 * 1024 * 1024:
        return 48 * 1024 * 1024
    return 100 * 1024 * 1024


def basic_block_apply(x_nchw, params, eps=1e-5):
    """NCHW in/out; builds lane-dense slab and launches the fused kernel."""
    N, C, H, W = x_nchw.shape
    wc = W * C
    # Lane-dense layout requirement (unmasked vst, aligned concats).
    assert wc % 128 == 0, "lane-dense layout needs W*C to be a multiple of 128"
    Cout = params["m1"].shape[-1] // W

    x = jnp.transpose(x_nchw, (0, 2, 3, 1)).astype(jnp.float32)    # NHWC
    x2d = x.reshape(N * H, wc)                                     # lane-dense slab

    kern = functools.partial(_basic_block_kernel, n=N, h=H, w=W, c=C, eps=eps)
    vmem = pl.BlockSpec(memory_space=pltpu.MemorySpace.VMEM)

    # Actual MXU work: two banded-Toeplitz convs + BN fold/broadcast matmuls.
    conv_flops = 2 * (2 * (N * H) * (3 * wc) * (W * Cout))
    bn_flops = 2 * (2 * 2 * wc * C + 2 * 2 * C * wc)
    bytes_accessed = (2 * N * H * wc) * 4 \
        + (params["m1"].size + params["m2"].size) * 2 \
        + (params["fold"].size + params["foldt"].size) * 2 + 4 * C * 4

    out2d = pl.pallas_call(
        kern,
        out_shape=jax.ShapeDtypeStruct((N * H, W * Cout), jnp.float32),
        in_specs=[vmem] * 9,
        out_specs=vmem,
        compiler_params=pltpu.CompilerParams(vmem_limit_bytes=_vmem_limit_bytes()),
        cost_estimate=pl.CostEstimate(flops=int(conv_flops + bn_flops),
                                      transcendentals=int(2 * C),
                                      bytes_accessed=int(bytes_accessed)),
    )(x2d, params["m1"], params["g1"], params["b1"],
      params["m2"], params["g2"], params["b2"], params["fold"], params["foldt"])

    return jnp.transpose(out2d.reshape(N, H, W, Cout), (0, 3, 1, 2))  # back to NCHW


def basic_block_reference(x_nchw, w1, g1, b1, w2, g2, b2, eps=1e-5):
    """Pure-JAX f32 reference (lax.conv) for correctness checking."""
    x = jnp.transpose(x_nchw, (0, 2, 3, 1)).astype(jnp.float32)
    dn = lax.conv_dimension_numbers(x.shape, w1.shape, ('NHWC', 'HWIO', 'NHWC'))

    def bn(y, g, b):
        m = jnp.mean(y, axis=(0, 1, 2))
        v = jnp.mean((y - m) ** 2, axis=(0, 1, 2))
        return (y - m) * lax.rsqrt(v + eps) * g + b

    y = lax.conv_general_dilated(x, w1, (1, 1), ((1, 1), (1, 1)),
                                 dimension_numbers=dn)
    y = jnp.maximum(bn(y, g1, b1), 0.0)
    y2 = lax.conv_general_dilated(y, w2, (1, 1), ((1, 1), (1, 1)),
                                  dimension_numbers=dn)
    y2 = jnp.maximum(bn(y2, g2, b2) + x, 0.0)
    return jnp.transpose(y2, (0, 3, 1, 2))


if __name__ == "__main__":
    # BasicBlock(inplanes=8, planes=8, stride=1, downsample=None)
    N, C, H, W = 2, 8, 16, 16
    key = jax.random.PRNGKey(0)
    kx, kw1, kw2 = jax.random.split(key, 3)

    x = jax.random.normal(kx, (N, C, H, W), jnp.float32)
    # Conv weights in HWIO (match nn.Conv2d 3x3, bias=False).  Round to bf16 once
    # so the f32 reference and the bf16-MXU kernel see identical weight values.
    w1 = (jax.random.normal(kw1, (3, 3, C, C), jnp.float32) * 0.1
          ).astype(jnp.bfloat16).astype(jnp.float32)
    w2 = (jax.random.normal(kw2, (3, 3, C, C), jnp.float32) * 0.1
          ).astype(jnp.bfloat16).astype(jnp.float32)
    # BatchNorm2d default init: gamma=1, beta=0
    g1 = jnp.ones((C,), jnp.float32)
    b1 = jnp.zeros((C,), jnp.float32)
    g2 = jnp.ones((C,), jnp.float32)
    b2 = jnp.zeros((C,), jnp.float32)

    # Weight prep done ONCE, outside the per-call path.
    params = jax.tree_util.tree_map(jax.block_until_ready,
                                    prepare_basic_block_params(w1, g1, b1, w2, g2, b2, W))

    run = jax.jit(functools.partial(basic_block_apply, eps=1e-5))
    out = jax.block_until_ready(run(x, params))
    ref = jax.block_until_ready(basic_block_reference(x, w1, g1, b1, w2, g2, b2))

    assert out.shape == (N, C, H, W)
    max_err = float(jnp.max(jnp.abs(out - ref)))
    # bf16 matmul inputs + f32 accumulation vs f32 reference
    assert jnp.allclose(out, ref, atol=3e-2, rtol=3e-2), max_err

    print("KERNEL_OK")
</pallas_src>

<mosaic_0001>
module attributes {stable_mosaic.version = 11 : i64} {
  func.func @_basic_block_kernel(%arg0: memref<32x128xf32, #tpu.memory_space<vmem>>, %arg1: memref<384x128xbf16, #tpu.memory_space<vmem>>, %arg2: memref<1x8xf32, #tpu.memory_space<vmem>>, %arg3: memref<1x8xf32, #tpu.memory_space<vmem>>, %arg4: memref<384x128xbf16, #tpu.memory_space<vmem>>, %arg5: memref<1x8xf32, #tpu.memory_space<vmem>>, %arg6: memref<1x8xf32, #tpu.memory_space<vmem>>, %arg7: memref<128x8xbf16, #tpu.memory_space<vmem>>, %arg8: memref<8x128xbf16, #tpu.memory_space<vmem>>, %arg9: memref<32x128xf32, #tpu.memory_space<vmem>>) attributes {dimension_semantics = [], scalar_prefetch = 0 : i64, scratch_operands = 0 : i64, tpu.core_type = #tpu.core_type<tc>} {
    %c0 = arith.constant 0 : index
    %c0_0 = arith.constant 0 : index
    %0 = vector.load %arg0[%c0, %c0_0] : memref<32x128xf32, #tpu.memory_space<vmem>>, vector<32x128xf32>
    %1 = arith.truncf %0 : vector<32x128xf32> to vector<32x128xbf16>
    %cst = arith.constant 0.000000e+00 : f32
    %2 = vector.broadcast %cst : f32 to vector<2x1x128xf32>
    %c0_1 = arith.constant 0 : index
    %c0_2 = arith.constant 0 : index
    %3 = vector.load %arg7[%c0_1, %c0_2] : memref<128x8xbf16, #tpu.memory_space<vmem>>, vector<128x8xbf16>
    %4 = arith.extf %3 : vector<128x8xbf16> to vector<128x8xf32>
    %c0_3 = arith.constant 0 : index
    %c0_4 = arith.constant 0 : index
    %5 = vector.load %arg8[%c0_3, %c0_4] : memref<8x128xbf16, #tpu.memory_space<vmem>>, vector<8x128xbf16>
    %6 = arith.extf %5 : vector<8x128xbf16> to vector<8x128xf32>
    %c0_5 = arith.constant 0 : index
    %c0_6 = arith.constant 0 : index
    %7 = vector.load %arg1[%c0_5, %c0_6] : memref<384x128xbf16, #tpu.memory_space<vmem>>, vector<128x128xbf16>
    %cst_7 = arith.constant dense<0.000000e+00> : vector<32x128xf32>
    %8 = tpu.matmul %1, %7, %cst_7 {dimension_numbers = #tpu.dot_dimension_numbers<[1], [0], [0], [1], [0, 0, 1, 1], [], []>} : vector<32x128xbf16>, vector<128x128xbf16>, vector<32x128xf32> -> vector<32x128xf32>
    %c128 = arith.constant 128 : index
    %c0_8 = arith.constant 0 : index
    %9 = vector.load %arg1[%c128, %c0_8] : memref<384x128xbf16, #tpu.memory_space<vmem>>, vector<128x128xbf16>
    %cst_9 = arith.constant dense<0.000000e+00> : vector<32x128xf32>
    %10 = tpu.matmul %1, %9, %cst_9 {dimension_numbers = #tpu.dot_dimension_numbers<[1], [0], [0], [1], [0, 0, 1, 1], [], []>} : vector<32x128xbf16>, vector<128x128xbf16>, vector<32x128xf32> -> vector<32x128xf32>
    %c256 = arith.constant 256 : index
    %c0_10 = arith.constant 0 : index
    %11 = vector.load %arg1[%c256, %c0_10] : memref<384x128xbf16, #tpu.memory_space<vmem>>, vector<128x128xbf16>
    %cst_11 = arith.constant dense<0.000000e+00> : vector<32x128xf32>
    %12 = tpu.matmul %1, %11, %cst_11 {dimension_numbers = #tpu.dot_dimension_numbers<[1], [0], [0], [1], [0, 0, 1, 1], [], []>} : vector<32x128xbf16>, vector<128x128xbf16>, vector<32x128xf32> -> vector<32x128xf32>
    %13 = vector.shape_cast %8 : vector<32x128xf32> to vector<2x16x128xf32>
    %14 = vector.shape_cast %12 : vector<32x128xf32> to vector<2x16x128xf32>
    %15 = vector.shape_cast %10 : vector<32x128xf32> to vector<2x16x128xf32>
    %16 = vector.extract_strided_slice %13 {offsets = [0, 0, 0], sizes = [2, 15, 128], strides = [1, 1, 1]} : vector<2x16x128xf32> to vector<2x15x128xf32>
    %17 = tpu.concatenate %2, %16 in 1 : vector<2x1x128xf32>, vector<2x15x128xf32> -> vector<2x16x128xf32>
    %18 = arith.addf %15, %17 : vector<2x16x128xf32>
    %19 = vector.extract_strided_slice %14 {offsets = [0, 1, 0], sizes = [2, 15, 128], strides = [1, 1, 1]} : vector<2x16x128xf32> to vector<2x15x128xf32>
    %20 = tpu.concatenate %19, %2 in 1 : vector<2x15x128xf32>, vector<2x1x128xf32> -> vector<2x16x128xf32>
    %21 = arith.addf %18, %20 : vector<2x16x128xf32>
    %22 = vector.shape_cast %21 : vector<2x16x128xf32> to vector<32x128xf32>
    %cst_12 = arith.constant dense<0.000000e+00> : vector<128xf32>
    %23 = vector.multi_reduction <add>, %22, %cst_12 [0] : vector<32x128xf32> to vector<128xf32>
    %24 = vector.shape_cast %23 : vector<128xf32> to vector<1x128xf32>
    %25 = arith.mulf %22, %22 : vector<32x128xf32>
    %cst_13 = arith.constant dense<0.000000e+00> : vector<128xf32>
    %26 = vector.multi_reduction <add>, %25, %cst_13 [0] : vector<32x128xf32> to vector<128xf32>
    %27 = vector.shape_cast %26 : vector<128xf32> to vector<1x128xf32>
    %28 = tpu.concatenate %24, %27 in 0 : vector<1x128xf32>, vector<1x128xf32> -> vector<2x128xf32>
    %cst_14 = arith.constant dense<0.000000e+00> : vector<2x8xf32>
    %29 = tpu.matmul %28, %4, %cst_14 {dimension_numbers = #tpu.dot_dimension_numbers<[1], [0], [0], [1], [0, 0, 1, 1], [], []>} : vector<2x128xf32>, vector<128x8xf32>, vector<2x8xf32> -> vector<2x8xf32>
    %30 = vector.extract_strided_slice %29 {offsets = [0, 0], sizes = [1, 8], strides = [1, 1]} : vector<2x8xf32> to vector<1x8xf32>
    %cst_15 = arith.constant 0.001953125 : f32
    %31 = vector.broadcast %cst_15 : f32 to vector<1x8xf32>
    %32 = arith.mulf %30, %31 : vector<1x8xf32>
    %33 = vector.extract_strided_slice %29 {offsets = [1, 0], sizes = [1, 8], strides = [1, 1]} : vector<2x8xf32> to vector<1x8xf32>
    %cst_16 = arith.constant 0.001953125 : f32
    %34 = vector.broadcast %cst_16 : f32 to vector<1x8xf32>
    %35 = arith.mulf %33, %34 : vector<1x8xf32>
    %36 = arith.mulf %32, %32 : vector<1x8xf32>
    %37 = arith.subf %35, %36 : vector<1x8xf32>
    %c0_17 = arith.constant 0 : index
    %c0_18 = arith.constant 0 : index
    %38 = vector.load %arg2[%c0_17, %c0_18] : memref<1x8xf32, #tpu.memory_space<vmem>>, vector<1x8xf32>
    %cst_19 = arith.constant 9.99999974E-6 : f32
    %39 = vector.broadcast %cst_19 : f32 to vector<1x8xf32>
    %40 = arith.addf %37, %39 : vector<1x8xf32>
    %41 = math.rsqrt %40 : vector<1x8xf32>
    %42 = arith.mulf %38, %41 : vector<1x8xf32>
    %c0_20 = arith.constant 0 : index
    %c0_21 = arith.constant 0 : index
    %43 = vector.load %arg3[%c0_20, %c0_21] : memref<1x8xf32, #tpu.memory_space<vmem>>, vector<1x8xf32>
    %44 = arith.mulf %32, %42 : vector<1x8xf32>
    %45 = arith.subf %43, %44 : vector<1x8xf32>
    %46 = tpu.concatenate %42, %45 in 0 : vector<1x8xf32>, vector<1x8xf32> -> vector<2x8xf32>
    %cst_22 = arith.constant dense<0.000000e+00> : vector<2x128xf32>
    %47 = tpu.matmul %46, %6, %cst_22 {dimension_numbers = #tpu.dot_dimension_numbers<[1], [0], [0], [1], [0, 0, 1, 1], [], []>} : vector<2x8xf32>, vector<8x128xf32>, vector<2x128xf32> -> vector<2x128xf32>
    %48 = vector.extract_strided_slice %47 {offsets = [0, 0], sizes = [1, 128], strides = [1, 1]} : vector<2x128xf32> to vector<1x128xf32>
    %49 = vector.extract_strided_slice %47 {offsets = [1, 0], sizes = [1, 128], strides = [1, 1]} : vector<2x128xf32> to vector<1x128xf32>
    %50 = vector.broadcast %48 : vector<1x128xf32> to vector<32x128xf32>
    %51 = arith.mulf %22, %50 : vector<32x128xf32>
    %52 = vector.broadcast %49 : vector<1x128xf32> to vector<32x128xf32>
    %53 = arith.addf %51, %52 : vector<32x128xf32>
    %cst_23 = arith.constant 0.000000e+00 : f32
    %54 = vector.broadcast %cst_23 : f32 to vector<32x128xf32>
    %55 = arith.maximumf %53, %54 : vector<32x128xf32>
    %56 = arith.truncf %55 : vector<32x128xf32> to vector<32x128xbf16>
    %c0_24 = arith.constant 0 : index
    %c0_25 = arith.constant 0 : index
    %57 = vector.load %arg4[%c0_24, %c0_25] : memref<384x128xbf16, #tpu.memory_space<vmem>>, vector<128x128xbf16>
    %cst_26 = arith.constant dense<0.000000e+00> : vector<32x128xf32>
    %58 = tpu.matmul %56, %57, %cst_26 {dimension_numbers = #tpu.dot_dimension_numbers<[1], [0], [0], [1], [0, 0, 1, 1], [], []>} : vector<32x128xbf16>, vector<128x128xbf16>, vector<32x128xf32> -> vector<32x128xf32>
    %c128_27 = arith.constant 128 : index
    %c0_28 = arith.constant 0 : index
    %59 = vector.load %arg4[%c128_27, %c0_28] : memref<384x128xbf16, #tpu.memory_space<vmem>>, vector<128x128xbf16>
    %cst_29 = arith.constant dense<0.000000e+00> : vector<32x128xf32>
    %60 = tpu.matmul %56, %59, %cst_29 {dimension_numbers = #tpu.dot_dimension_numbers<[1], [0], [0], [1], [0, 0, 1, 1], [], []>} : vector<32x128xbf16>, vector<128x128xbf16>, vector<32x128xf32> -> vector<32x128xf32>
    %c256_30 = arith.constant 256 : index
    %c0_31 = arith.constant 0 : index
    %61 = vector.load %arg4[%c256_30, %c0_31] : memref<384x128xbf16, #tpu.memory_space<vmem>>, vector<128x128xbf16>
    %cst_32 = arith.constant dense<0.000000e+00> : vector<32x128xf32>
    %62 = tpu.matmul %56, %61, %cst_32 {dimension_numbers = #tpu.dot_dimension_numbers<[1], [0], [0], [1], [0, 0, 1, 1], [], []>} : vector<32x128xbf16>, vector<128x128xbf16>, vector<32x128xf32> -> vector<32x128xf32>
    %63 = vector.shape_cast %58 : vector<32x128xf32> to vector<2x16x128xf32>
    %64 = vector.shape_cast %62 : vector<32x128xf32> to vector<2x16x128xf32>
    %65 = vector.shape_cast %60 : vector<32x128xf32> to vector<2x16x128xf32>
    %66 = vector.extract_strided_slice %63 {offsets = [0, 0, 0], sizes = [2, 15, 128], strides = [1, 1, 1]} : vector<2x16x128xf32> to vector<2x15x128xf32>
    %67 = tpu.concatenate %2, %66 in 1 : vector<2x1x128xf32>, vector<2x15x128xf32> -> vector<2x16x128xf32>
    %68 = arith.addf %65, %67 : vector<2x16x128xf32>
    %69 = vector.extract_strided_slice %64 {offsets = [0, 1, 0], sizes = [2, 15, 128], strides = [1, 1, 1]} : vector<2x16x128xf32> to vector<2x15x128xf32>
    %70 = tpu.concatenate %69, %2 in 1 : vector<2x15x128xf32>, vector<2x1x128xf32> -> vector<2x16x128xf32>
    %71 = arith.addf %68, %70 : vector<2x16x128xf32>
    %72 = vector.shape_cast %71 : vector<2x16x128xf32> to vector<32x128xf32>
    %cst_33 = arith.constant dense<0.000000e+00> : vector<128xf32>
    %73 = vector.multi_reduction <add>, %72, %cst_33 [0] : vector<32x128xf32> to vector<128xf32>
    %74 = vector.shape_cast %73 : vector<128xf32> to vector<1x128xf32>
    %75 = arith.mulf %72, %72 : vector<32x128xf32>
    %cst_34 = arith.constant dense<0.000000e+00> : vector<128xf32>
    %76 = vector.multi_reduction <add>, %75, %cst_34 [0] : vector<32x128xf32> to vector<128xf32>
    %77 = vector.shape_cast %76 : vector<128xf32> to vector<1x128xf32>
    %78 = tpu.concatenate %74, %77 in 0 : vector<1x128xf32>, vector<1x128xf32> -> vector<2x128xf32>
    %cst_35 = arith.constant dense<0.000000e+00> : vector<2x8xf32>
    %79 = tpu.matmul %78, %4, %cst_35 {dimension_numbers = #tpu.dot_dimension_numbers<[1], [0], [0], [1], [0, 0, 1, 1], [], []>} : vector<2x128xf32>, vector<128x8xf32>, vector<2x8xf32> -> vector<2x8xf32>
    %80 = vector.extract_strided_slice %79 {offsets = [0, 0], sizes = [1, 8], strides = [1, 1]} : vector<2x8xf32> to vector<1x8xf32>
    %cst_36 = arith.constant 0.001953125 : f32
    %81 = vector.broadcast %cst_36 : f32 to vector<1x8xf32>
    %82 = arith.mulf %80, %81 : vector<1x8xf32>
    %83 = vector.extract_strided_slice %79 {offsets = [1, 0], sizes = [1, 8], strides = [1, 1]} : vector<2x8xf32> to vector<1x8xf32>
    %cst_37 = arith.constant 0.001953125 : f32
    %84 = vector.broadcast %cst_37 : f32 to vector<1x8xf32>
    %85 = arith.mulf %83, %84 : vector<1x8xf32>
    %86 = arith.mulf %82, %82 : vector<1x8xf32>
    %87 = arith.subf %85, %86 : vector<1x8xf32>
    %c0_38 = arith.constant 0 : index
    %c0_39 = arith.constant 0 : index
    %88 = vector.load %arg5[%c0_38, %c0_39] : memref<1x8xf32, #tpu.memory_space<vmem>>, vector<1x8xf32>
    %cst_40 = arith.constant 9.99999974E-6 : f32
    %89 = vector.broadcast %cst_40 : f32 to vector<1x8xf32>
    %90 = arith.addf %87, %89 : vector<1x8xf32>
    %91 = math.rsqrt %90 : vector<1x8xf32>
    %92 = arith.mulf %88, %91 : vector<1x8xf32>
    %c0_41 = arith.constant 0 : index
    %c0_42 = arith.constant 0 : index
    %93 = vector.load %arg6[%c0_41, %c0_42] : memref<1x8xf32, #tpu.memory_space<vmem>>, vector<1x8xf32>
    %94 = arith.mulf %82, %92 : vector<1x8xf32>
    %95 = arith.subf %93, %94 : vector<1x8xf32>
    %96 = tpu.concatenate %92, %95 in 0 : vector<1x8xf32>, vector<1x8xf32> -> vector<2x8xf32>
    %cst_43 = arith.constant dense<0.000000e+00> : vector<2x128xf32>
    %97 = tpu.matmul %96, %6, %cst_43 {dimension_numbers = #tpu.dot_dimension_numbers<[1], [0], [0], [1], [0, 0, 1, 1], [], []>} : vector<2x8xf32>, vector<8x128xf32>, vector<2x128xf32> -> vector<2x128xf32>
    %98 = vector.extract_strided_slice %97 {offsets = [0, 0], sizes = [1, 128], strides = [1, 1]} : vector<2x128xf32> to vector<1x128xf32>
    %99 = vector.extract_strided_slice %97 {offsets = [1, 0], sizes = [1, 128], strides = [1, 1]} : vector<2x128xf32> to vector<1x128xf32>
    %100 = vector.broadcast %98 : vector<1x128xf32> to vector<32x128xf32>
    %101 = arith.mulf %72, %100 : vector<32x128xf32>
    %102 = vector.broadcast %99 : vector<1x128xf32> to vector<32x128xf32>
    %103 = arith.addf %101, %102 : vector<32x128xf32>
    %104 = arith.addf %103, %0 : vector<32x128xf32>
    %cst_44 = arith.constant 0.000000e+00 : f32
    %105 = vector.broadcast %cst_44 : f32 to vector<32x128xf32>
    %106 = arith.maximumf %104, %105 : vector<32x128xf32>
    %c0_45 = arith.constant 0 : index
    %c0_46 = arith.constant 0 : index
    %107 = vector.load %arg9[%c0_45, %c0_46] : memref<32x128xf32, #tpu.memory_space<vmem>>, vector<32x128xf32>
    tpu.vector_store %arg9[%c0_45, %c0_46], %106 {strides = array<i32>} : memref<32x128xf32, #tpu.memory_space<vmem>>, vector<32x128xf32>,
    return
  }
}

</mosaic_0001>

<bundles_post_ra>
// kernel: basic_block_apply.1
= control target key start
LH: loop header
LB: loop body
LE: loop exit
PB: predicated region body
PF: predicated region fallthrough
CT: control target
= control target key end

     0   :  { %vm325_vm0 = vcmask 1040384   ;;  %vm346_vm1 = vcmask 1046528   ;;  %vm437_vm5 = vcmask 64512   ;;  %s1614_s1 = inlined_call_operand.vmem [shape: bf16[384,128], index: 1, kind: input, shape index: {}]   ;;  %s1615_s0 = inlined_call_operand.vmem [shape: f32[32,128], index: 0, kind: input, shape index: {}]   ;;  %s1616_s7 = inlined_call_operand.vmem [shape: bf16[128,8], index: 7, kind: input, shape index: {}]   ;;  %s1617_s8 = inlined_call_operand.vmem [shape: bf16[8,128], index: 8, kind: input, shape index: {}]   ;;  %s1618_s4 = inlined_call_operand.vmem [shape: bf16[384,128], index: 4, kind: input, shape index: {}]   ;;  %s1619_s2 = inlined_call_operand.vmem [shape: f32[1,8], index: 2, kind: input, shape index: {}]   ;;  %s1620_s3 = inlined_call_operand.vmem [shape: f32[1,8], index: 3, kind: input, shape index: {}]   ;;  %s1621_s5 = inlined_call_operand.vmem [shape: f32[1,8], index: 5, kind: input, shape index: {}]   ;;  %s1622_s6 = inlined_call_operand.vmem [shape: f32[1,8], index: 6, kind: input, shape index: {}]   ;;  %s1623_s9 = inlined_call_operand.vmem [shape: f32[32,128], index: 9, kind: output, shape index: {}]  }
   0x1   :  { %v1090_v0 = vld [vmem:[%s1614_s1 + $0x38] sm:$0xff]  ;;  %v1089_v3 = vld [vmem:[%s1614_s1 + $0x30] sm:$0xff]  ;;  %v1088_v6 = vld [vmem:[%s1614_s1 + $0x28] sm:$0xff] }
   0x2   :  { %v1106_v1 = vld [vmem:[%s1614_s1 + $0xb8] sm:$0xff]  ;;  %136 = vmatpush.bf16.msra.mxu0 %v1090_v0  ;;  %v1105_v4 = vld [vmem:[%s1614_s1 + $0xb0] sm:$0xff]  ;;  %v1104_v7 = vld [vmem:[%s1614_s1 + $0xa8] sm:$0xff] }
   0x3   :  { %v1098_v2 = vld [vmem:[%s1614_s1 + $0x78] sm:$0xff]  ;;  %302 = vmatpush.bf16.msra.mxu2 %v1106_v1  ;;  %v1097_v5 = vld [vmem:[%s1614_s1 + $0x70] sm:$0xff]  ;;  %v1096_v8 = vld [vmem:[%s1614_s1 + $0x68] sm:$0xff] }
   0x4   :  { %219 = vmatpush.bf16.msra.mxu1 %v1098_v2  ;;  %v1087_v9 = vld [vmem:[%s1614_s1 + $0x20] sm:$0xff]  ;;  %v1086_v12 = vld [vmem:[%s1614_s1 + $0x18] sm:$0xff]  ;;  %v1085_v15 = vld [vmem:[%s1614_s1 + $0x10] sm:$0xff] }
   0x5   :  { %v1103_v10 = vld [vmem:[%s1614_s1 + $0xa0] sm:$0xff]  ;;  %v1102_v13 = vld [vmem:[%s1614_s1 + $0x98] sm:$0xff]  ;;  %v1101_v16 = vld [vmem:[%s1614_s1 + $0x90] sm:$0xff] }
   0x6   :  { %137 = vmatpush.bf16.msra.mxu0 %v1089_v3  ;;  %v1095_v11 = vld [vmem:[%s1614_s1 + $0x60] sm:$0xff]  ;;  %v1094_v14 = vld [vmem:[%s1614_s1 + $0x58] sm:$0xff]  ;;  %v1093_v17 = vld [vmem:[%s1614_s1 + $0x50] sm:$0xff] }
   0x7   :  { %303 = vmatpush.bf16.msra.mxu2 %v1105_v4  ;;  %v1084_v18 = vld [vmem:[%s1614_s1 + $0x8] sm:$0xff]  ;;  %v1083_v21 = vld [vmem:[%s1614_s1] sm:$0xff]  ;;  %v1311_v27 = vld [vmem:[%s1615_s0 + $0x10] sm:$0xff] }
   0x8   :  { %220 = vmatpush.bf16.msra.mxu1 %v1097_v5  ;;  %v1100_v19 = vld [vmem:[%s1614_s1 + $0x88] sm:$0xff]  ;;  %v1099_v22 = vld [vmem:[%s1614_s1 + $0x80] sm:$0xff]  ;;  %v1316_v28 = vld [vmem:[%s1615_s0 + $0x18] sm:$0xff] }
   0x9   :  { %v1092_v20 = vld [vmem:[%s1614_s1 + $0x48] sm:$0xff]  ;;  %v1296_v23 = vld [vmem:[%s1615_s0] sm:$0xff]  ;;  %v37_v29 = vpack.c.bf16 %v1316_v28, %v1311_v27  ;;  %v1323_v30 = vld [vmem:[%s1616_s7 + $0x38] sm:$0xff]  }
   0xa   :  { %138 = vmatpush.bf16.msra.mxu0 %v1088_v6  ;;  %v1301_v24 = vld [vmem:[%s1615_s0 + $0x8] sm:$0xff]  ;;  %v1091_v25 = vld [vmem:[%s1614_s1 + $0x40] sm:$0xff]  ;;  %v1162_v31 = vunpack.c.h.bf16 %v1323_v30  ;;  %v1161_v32 = vunpack.c.l.bf16 %v1323_v30  ;;  %v1332_v33 = vld [vmem:[%s1616_s7 + $0x30] sm:$0xff]  }
   0xb   :  { %304 = vmatpush.bf16.msra.mxu2 %v1104_v7  ;;  %v36_v26 = vpack.c.bf16 %v1301_v24, %v1296_v23  ;;  %v1158_v34 = vunpack.c.h.bf16 %v1332_v33  ;;  %v1157_v35 = vunpack.c.l.bf16 %v1332_v33  ;;  %v1343_v36 = vld [vmem:[%s1616_s7 + $0x28] sm:$0xff]   ;;  %v1354_v41 = vld [vmem:[%s1616_s7 + $0x20] sm:$0xff]   ;;  %v1365_v44 = vld [vmem:[%s1616_s7 + $0x18] sm:$0xff]  }
   0xc   :  { %221 = vmatpush.bf16.msra.mxu1 %v1096_v8  ;;  %386 = vmatpush.msra.mxu3 %v1162_v31  ;;  %v1154_v37 = vunpack.c.h.bf16 %v1343_v36  ;;  %v1153_v39 = vunpack.c.l.bf16 %v1343_v36  ;;  %v1150_v42 = vunpack.c.h.bf16 %v1354_v41  ;;  %v1149_v43 = vunpack.c.l.bf16 %v1354_v41  ;;  %v1376_v49 = vld [vmem:[%s1616_s7 + $0x10] sm:$0xff]   ;;  %v1382_v51 = vld [vmem:[%s1616_s7 + $0x8] sm:$0xff]   ;;  %v1393_v55 = vld [vmem:[%s1616_s7] sm:$0xff]  }
   0xd   :  { %v1146_v46 = vunpack.c.h.bf16 %v1365_v44  ;;  %v1145_v48 = vunpack.c.l.bf16 %v1365_v44  ;;  %v1142_v50 = vunpack.c.h.bf16 %v1376_v49  ;;  %v1141_v52 = vunpack.c.l.bf16 %v1376_v49  ;;  %v1120_v30 = vld [vmem:[%s1618_s4 + $0x68] sm:$0xff]  ;;  %v1119_v33 = vld [vmem:[%s1618_s4 + $0x60] sm:$0xff]  ;;  %v1118_v36 = vld [vmem:[%s1618_s4 + $0x58] sm:$0xff] }
   0xe   :  { %139 = vmatpush.bf16.msra.mxu0 %v1087_v9  ;;  %387 = vmatpush.msra.mxu3 %v1161_v32  ;;  %v1138_v54 = vunpack.c.h.bf16 %v1382_v51  ;;  %v1137_v57 = vunpack.c.l.bf16 %v1382_v51  ;;  %v1134_v59 = vunpack.c.h.bf16 %v1393_v55  ;;  %v1133_v60 = vunpack.c.l.bf16 %v1393_v55  ;;  %v1109_v51 = vld [vmem:[%s1618_s4 + $0x10] sm:$0xff]  ;;  %v1108_v55 = vld [vmem:[%s1618_s4 + $0x8] sm:$0xff] }
   0xf   :  { %305 = vmatpush.bf16.msra.mxu2 %v1103_v10 }
  0x10   :  { %222 = vmatpush.bf16.msra.mxu1 %v1095_v11  ;;  %388 = vmatpush.msra.mxu3 %v1158_v34 }
  0x12   :  { %140 = vmatpush.bf16.msra.mxu0 %v1086_v12  ;;  %389 = vmatpush.msra.mxu3 %v1157_v35 }
  0x13   :  { %306 = vmatpush.bf16.msra.mxu2 %v1102_v13 }
  0x14   :  { %223 = vmatpush.bf16.msra.mxu1 %v1094_v14  ;;  %390 = vmatpush.msra.mxu3 %v1154_v37 }
  0x16   :  { %141 = vmatpush.bf16.msra.mxu0 %v1085_v15  ;;  %391 = vmatpush.msra.mxu3 %v1153_v39 }
  0x17   :  { %307 = vmatpush.bf16.msra.mxu2 %v1101_v16 }
  0x18   :  { %224 = vmatpush.bf16.msra.mxu1 %v1093_v17  ;;  %392 = vmatpush.msra.mxu3 %v1150_v42 }
  0x1a   :  { %142 = vmatpush.bf16.msra.mxu0 %v1084_v18  ;;  %393 = vmatpush.msra.mxu3 %v1149_v43 }
  0x1b   :  { %308 = vmatpush.bf16.msra.mxu2 %v1100_v19 }
  0x1c   :  { %225 = vmatpush.bf16.msra.mxu1 %v1092_v20  ;;  %394 = vmatpush.msra.mxu3 %v1146_v46 }
  0x1e   :  { %143 = vmatpush.bf16.msra.mxu0 %v1083_v21  ;;  %395 = vmatpush.msra.mxu3 %v1145_v48 }
  0x1f   :  { %309 = vmatpush.bf16.msra.mxu2 %v1099_v22 }
  0x20   :  { %226 = vmatpush.bf16.msra.mxu1 %v1091_v25  ;;  %396 = vmatpush.msra.mxu3 %v1142_v50 }
  0x21   :  { %144 = vmatmul.bf16.vlgmr.msra.gmra.mxu0 %v36_v26 }
  0x22   :  { %310 = vmatmul.bf16.vlgmr.msra.gmra.mxu2 %v36_v26  ;;  %397 = vmatpush.msra.mxu3 %v1141_v52 }
  0x23   :  { %227 = vmatmul.bf16.vlgmr.msra.gmra.mxu1 %v36_v26 }
  0x24   :  { %398 = vmatpush.msra.mxu3 %v1138_v54 }
  0x26   :  { %399 = vmatpush.msra.mxu3 %v1137_v57 }
  0x28   :  { %400 = vmatpush.msra.mxu3 %v1134_v59 }
  0x2a   :  { %401 = vmatpush.msra.mxu3 %v1133_v60 }
  0x31   :  { %149 = vmatmul.bf16.gmra.mxu0 %v37_v29 }
  0x32   :  { %315 = vmatmul.bf16.gmra.mxu2 %v37_v29 }
  0x33   :  { %232 = vmatmul.bf16.gmra.mxu1 %v37_v29 }
  0x9e   :  { %v145_v38 = vpop.f32.mrf.mxu0 }
  0x9f   :  { %v326_v61 = vrot.slane %v145_v38, 7 }
  0xa0   :  { %v228_v40 = vpop.f32.mrf.mxu1 }
  0xa1   :  { %v336_v2 = vsel %vm325_vm0, 0.0, %v326_v61 }
  0xa2   :  { %v338_v10 = vadd.f32 %v336_v2, %v228_v40 }
  0xa5   :  { %v311_v45 = vpop.f32.mrf.mxu2 }
  0xa6   :  { %v147_v47 = vpop.f32.mrf.mxu0  ;;  %v347_v3 = vrot.slane %v311_v45, 1 }
  0xa7   :  { %v327_v62 = vrot.slane %v147_v47, 7 }
  0xa8   :  { %v230_v53 = vpop.f32.mrf.mxu1 }
  0xa9   :  { %v328_v4 = vsel %vm325_vm0, %v326_v61, %v327_v62 }
  0xaa   :  { %v339_v11 = vadd.f32 %v328_v4, %v230_v53 }
  0xad   :  { %v313_v56 = vpop.f32.mrf.mxu2 }
  0xae   :  { %v150_v58 = vpop.f32.mrf.mxu0  ;;  %v348_v63 = vrot.slane %v313_v56, 1 }
  0xaf   :  { %v329_v8 = vrot.slane %v150_v58, 7 }
  0xb0   :  { %v233_v0 = vpop.f32.mrf.mxu1  ;;  %v349_v6 = vsel %vm346_vm1, %v347_v3, %v348_v63  ;;  %v357_v7 = vsel %vm346_vm1, %v348_v63, 0.0 }
  0xb1   :  { %v1412_v12 = vadd.f32 %v349_v6, %v338_v10  ;;  %v1414_v13 = vadd.f32 %v357_v7, %v339_v11  ;;  %v337_v14 = vsel %vm325_vm0, 0.0, %v329_v8 }
  0xb2   :  { %v340_v22 = vadd.f32 %v337_v14, %v233_v0 }
  0xb3   :  { %v372_v20 = vmul.f32 %v1412_v12, %v1412_v12  ;;  %v373_v21 = vmul.f32 %v1414_v13, %v1414_v13  ;;  %v363_v38 = vadd.f32 %v1414_v13, %v1412_v12 }
  0xb5   :  { %v316_v1 = vpop.f32.mrf.mxu2  ;;  %v376_v47 = vadd.f32 %v373_v21, %v372_v20  ;;  %v1445_v21 = vld [vmem:[%s1617_s8] sm:$0xf] }
  0xb6   :  { %v152_v5 = vpop.f32.mrf.mxu0  ;;  %v350_v17 = vrot.slane %v316_v1, 1 }
  0xb7   :  { %v330_v9 = vrot.slane %v152_v5, 7 }
  0xb8   :  { %v235_v18 = vpop.f32.mrf.mxu1 }
  0xb9   :  { %v331_v15 = vsel %vm325_vm0, %v329_v8, %v330_v9 }
  0xba   :  { %v341_v25 = vadd.f32 %v331_v15, %v235_v18 }
  0xbd   :  { %v318_v16 = vpop.f32.mrf.mxu2 }
  0xbe   :  { %v351_v19 = vrot.slane %v318_v16, 1 }
  0xc0   :  { %v352_v26 = vsel %vm346_vm1, %v350_v17, %v351_v19  ;;  %v358_v29 = vsel %vm346_vm1, %v351_v19, 0.0 }
  0xc1   :  { %v1426_v40 = vadd.f32 %v352_v26, %v340_v22  ;;  %v1428_v45 = vadd.f32 %v358_v29, %v341_v25  ;;  %v71_v22 = vunpack.c.l.bf16 %v1445_v21  ;;  %v1130_v25 = vld [vmem:[%s1618_s4 + $0xb8] sm:$0xff] }
  0xc2   :  { %v1114_v26 = vld [vmem:[%s1618_s4 + $0x38] sm:$0xff]  ;;  %707 = vmatpush.bf16.msrb.mxu2 %v1130_v25 }
  0xc3   :  { %v364_v53 = vadd.f32 %v363_v38, %v1426_v40  ;;  %v374_v56 = vmul.f32 %v1426_v40, %v1426_v40  ;;  %v375_v61 = vmul.f32 %v1428_v45, %v1428_v45  ;;  %456 = vmatpush.msrb.mxu3 %v71_v22  ;;  %v1122_v29 = vld [vmem:[%s1618_s4 + $0x78] sm:$0xff]  ;;  %541 = vmatpush.bf16.msrb.mxu0 %v1114_v26  ;;  %v1129_v38 = vld [vmem:[%s1618_s4 + $0xb0] sm:$0xff] }
  0xc4   :  { %624 = vmatpush.bf16.msrb.mxu1 %v1122_v29 }
  0xc5   :  { %v365_v58 = vadd.f32 %v364_v53, %v1428_v45  ;;  %v377_v62 = vadd.f32 %v376_v47, %v374_v56  ;;  %v1113_v47 = vld [vmem:[%s1618_s4 + $0x30] sm:$0xff] }
  0xc6   :  { %v1121_v56 = vld [vmem:[%s1618_s4 + $0x70] sm:$0xff]  ;;  %708 = vmatpush.bf16.msrb.mxu2 %v1129_v38 }
  0xc7   :  { %v366_v63 = vrot.slane %v365_v58, 4  ;;  %v378_v0 = vadd.f32 %v377_v62, %v375_v61  ;;  %542 = vmatpush.bf16.msrb.mxu0 %v1113_v47  ;;  %v1128_v61 = vld [vmem:[%s1618_s4 + $0xa8] sm:$0xff] }
  0xc8   :  { %v1112_v62 = vld [vmem:[%s1618_s4 + $0x28] sm:$0xff]  ;;  %625 = vmatpush.bf16.msrb.mxu1 %v1121_v56 }
  0xc9   :  { %v367_v1 = vadd.f32 %v366_v63, %v365_v58  ;;  %v379_v2 = vrot.slane %v378_v0, 4  ;;  %v1127_v63 = vld [vmem:[%s1618_s4 + $0xa0] sm:$0xff] }
  0xca   :  { %709 = vmatpush.bf16.msrb.mxu2 %v1128_v61 }
  0xcb   :  { %v368_v3 = vrot.slane %v367_v1, 2  ;;  %v380_v4 = vadd.f32 %v379_v2, %v378_v0  ;;  %543 = vmatpush.bf16.msrb.mxu0 %v1112_v62  ;;  %v1111_v0 = vld [vmem:[%s1618_s4 + $0x20] sm:$0xff]  ;;  %v1110_v2 = vld [vmem:[%s1618_s4 + $0x18] sm:$0xff] }
  0xcc   :  { %626 = vmatpush.bf16.msrb.mxu1 %v1120_v30 }
  0xcd   :  { %v369_v5 = vadd.f32 %v368_v3, %v367_v1  ;;  %v381_v6 = vrot.slane %v380_v4, 2  ;;  %v1126_v1 = vld [vmem:[%s1618_s4 + $0x98] sm:$0xff]  ;;  %v1115_v3 = vld [vmem:[%s1618_s4 + $0x40] sm:$0xff] }
  0xce   :  { %710 = vmatpush.bf16.msrb.mxu2 %v1127_v63 }
  0xcf   :  { %v370_v7 = vrot.slane %v369_v5, 1  ;;  %v382_v8 = vadd.f32 %v381_v6, %v380_v4  ;;  %544 = vmatpush.bf16.msrb.mxu0 %v1111_v0 }
  0xd0   :  { %627 = vmatpush.bf16.msrb.mxu1 %v1119_v33 }
  0xd1   :  { %v383_v9 = vrot.slane %v382_v8, 1  ;;  %v371_v10 = vadd.f32 %v370_v7, %v369_v5 }
  0xd2   :  { %711 = vmatpush.bf16.msrb.mxu2 %v1126_v1 }
  0xd3   :  { %v384_v11 = vadd.f32 %v383_v9, %v382_v8  ;;  %545 = vmatpush.bf16.msrb.mxu0 %v1110_v2 }
  0xd4   :  { %628 = vmatpush.bf16.msrb.mxu1 %v1118_v36 }
  0xd5   :  { %v385_v14 = vsel %vm325_vm0, %v371_v10, %v384_v11 }
  0xd6   :  { %402 = vmatmul.f32.vlgmr.msra.gmra.mxu3 %v385_v14 }
  0xd7   :  { %789 = vmatpush.msra.mxu3 %v1162_v31  ;;  %546 = vmatpush.bf16.msrb.mxu0 %v1109_v51 }
  0xd9   :  { %790 = vmatpush.msra.mxu3 %v1161_v32 }
  0xdb   :  { %791 = vmatpush.msra.mxu3 %v1158_v34  ;;  %547 = vmatpush.bf16.msrb.mxu0 %v1108_v55 }
  0xdd   :  { %792 = vmatpush.msra.mxu3 %v1157_v35 }
  0xdf   :  { %793 = vmatpush.msra.mxu3 %v1154_v37 }
  0xe1   :  { %794 = vmatpush.msra.mxu3 %v1153_v39  ;;  %v1125_v39 = vld [vmem:[%s1618_s4 + $0x90] sm:$0xff] }
  0xe2   :  { %712 = vmatpush.bf16.msrb.mxu2 %v1125_v39 }
  0xe3   :  { %795 = vmatpush.msra.mxu3 %v1150_v42  ;;  %v412_v42 = vld [vmem:[%s1619_s2] sm:$0x1] }
  0xe5   :  { %796 = vmatpush.msra.mxu3 %v1149_v43 }
  0xe7   :  { %797 = vmatpush.msra.mxu3 %v1146_v46  ;;  %v430_v46 = vld [vmem:[%s1620_s3] sm:$0x1] }
  0xe9   :  { %798 = vmatpush.msra.mxu3 %v1145_v48 }
  0xeb   :  { %799 = vmatpush.msra.mxu3 %v1142_v50 }
  0xed   :  { %800 = vmatpush.msra.mxu3 %v1141_v52  ;;  %v1117_v52 = vld [vmem:[%s1618_s4 + $0x50] sm:$0xff] }
  0xee   :  { %629 = vmatpush.bf16.msrb.mxu1 %v1117_v52 }
  0xef   :  { %801 = vmatpush.msra.mxu3 %v1138_v54  ;;  %v1124_v54 = vld [vmem:[%s1618_s4 + $0x88] sm:$0xff] }
  0xf0   :  { %713 = vmatpush.bf16.msrb.mxu2 %v1124_v54 }
  0xf1   :  { %802 = vmatpush.msra.mxu3 %v1137_v57  ;;  %v1116_v57 = vld [vmem:[%s1618_s4 + $0x48] sm:$0xff] }
  0xf2   :  { %630 = vmatpush.bf16.msrb.mxu1 %v1116_v57 }
  0xf3   :  { %803 = vmatpush.msra.mxu3 %v1134_v59  ;;  %v1123_v59 = vld [vmem:[%s1618_s4 + $0x80] sm:$0xff] }
  0xf4   :  { %714 = vmatpush.bf16.msrb.mxu2 %v1123_v59 }
  0xf5   :  { %804 = vmatpush.msra.mxu3 %v1133_v60  ;;  %v1107_v60 = vld [vmem:[%s1618_s4] sm:$0xff] }
  0xf6   :  { %548 = vmatpush.bf16.msrb.mxu0 %v1107_v60  ;;  %631 = vmatpush.bf16.msrb.mxu1 %v1115_v3 }
 0x159   :  { %v403_v15 = vpop.f32.mrf.mxu3 }
 0x15a   :  { %v1437_v16 = vmul.f32 0.001953125, %v403_v15 }
 0x15c   :  { %v407_v17 = vmul.f32 %v1437_v16, %v1437_v16 }
 0x15e   :  { %v409_v18 = vrot.slane %v407_v17, 7 }
 0x160   :  { %v411_v19 = vsub.f32 %v1437_v16, %v409_v18 }
 0x162   :  { %v413_v20 = vadd.f32 1e-05, %v411_v19 }
 0x164   :  { %1170 = vrsqrt.f32 %v413_v20  ;;  %vm420_vm3 = vweird.f32 %v413_v20 }
 0x16a   :  { %v1171_v53 = vpop.eup %1170 }
 0x16b   :  { %v415_v31 = vmul.f32 %v1171_v53, %v413_v20  ;;  %vm421_vm2 = vweird.f32 %v1171_v53 }
 0x16c   :  { %vm422_vm4 = vmor %vm420_vm3, %vm421_vm2 }
 0x16d   :  { %v416_v58 = vmul.f32 %v1171_v53, %v415_v31 }
 0x16f   :  { %v417_v32 = vmul.f32 0.5, %v416_v58 }
 0x171   :  { %v418_v34 = vsub.f32 1.5, %v417_v32 }
 0x173   :  { %v419_v35 = vmul.f32 %v1171_v53, %v418_v34 }
 0x175   :  { %v423_v37 = vsel %vm422_vm4, %v1171_v53, %v419_v35 }
 0x176   :  { %425 = vst [vmem:[#allocation1] sm:$0xff] %v423_v37 }
 0x17d   :  { %v427_v41 = vld [vmem:[#allocation1 + $0x1] ss:$9 sm:$0xff] }
 0x17e   :  { %v429_v43 = vmul.f32 %v427_v41, %v412_v42 }
 0x180   :  { %v431_v44 = vmul.f32 %v429_v43, %v1437_v16 }
 0x182   :  { %v432_v48 = vsub.f32 %v430_v46, %v431_v44 }
 0x184   :  { %v434_v50 = vperm.slane %v432_v48, 0 }
 0x186   :  { %v436_v49 = vsel %vm325_vm0, %v429_v43, %v434_v50 }
 0x187   :  { %985 = vmatmul.msk.f32.vlgmr.msrb.gmra.mxu3 %vm437_vm5, %v436_v49 }
 0x188   :  { %858 = vmatpush.msrb.mxu3 %v71_v22 }
 0x20a   :  { %v458_v4 = vpop.f32.mrf.mxu3 }
 0x20b   :  { %v461_v5 = vperm.slane %v458_v4, 0  ;;  %v466_v6 = vperm.slane %v458_v4, 1 }
 0x20d   :  { %v462_v7 = vmul.f32 %v461_v5, %v1412_v12  ;;  %v463_v8 = vmul.f32 %v461_v5, %v1414_v13  ;;  %v464_v16 = vmul.f32 %v461_v5, %v1426_v40  ;;  %v465_v17 = vmul.f32 %v461_v5, %v1428_v45 }
 0x20f   :  { %v467_v9 = vadd.f32 %v466_v6, %v462_v7  ;;  %v468_v10 = vadd.f32 %v466_v6, %v463_v8  ;;  %v469_v18 = vadd.f32 %v466_v6, %v464_v16  ;;  %v470_v19 = vadd.f32 %v466_v6, %v465_v17 }
 0x211   :  { %v471_v11 = vmax.f32 %v467_v9, 0.0  ;;  %v472_v14 = vmax.f32 %v468_v10, 0.0  ;;  %v473_v20 = vmax.f32 %v469_v18, 0.0  ;;  %v474_v21 = vmax.f32 %v470_v19, 0.0 }
 0x213   :  { %v475_v15 = vpack.c.bf16 %v472_v14, %v471_v11  ;;  %v476_v22 = vpack.c.bf16 %v474_v21, %v473_v20 }
 0x215   :  { %549 = vmatmul.bf16.vlgmr.msrb.gmra.mxu0 %v475_v15  ;;  %632 = vmatmul.bf16.vlgmr.msrb.gmra.mxu1 %v475_v15 }
 0x216   :  { %715 = vmatmul.bf16.vlgmr.msrb.gmra.mxu2 %v475_v15 }
 0x225   :  { %554 = vmatmul.bf16.gmra.mxu0 %v476_v22  ;;  %637 = vmatmul.bf16.gmra.mxu1 %v476_v22 }
 0x226   :  { %720 = vmatmul.bf16.gmra.mxu2 %v476_v22 }
 0x292   :  { %v550_v12 = vpop.f32.mrf.mxu0  ;;  %v633_v13 = vpop.f32.mrf.mxu1 }
 0x293   :  { %v730_v53 = vrot.slane %v550_v12, 7 }
 0x295   :  { %v740_v58 = vsel %vm325_vm0, 0.0, %v730_v53 }
 0x296   :  { %v742_v33 = vadd.f32 %v740_v58, %v633_v13  ;;  %v815_v58 = vld [vmem:[%s1621_s5] sm:$0x1] }
 0x299   :  { %v716_v25 = vpop.f32.mrf.mxu2 }
 0x29a   :  { %v552_v26 = vpop.f32.mrf.mxu0  ;;  %v635_v29 = vpop.f32.mrf.mxu1  ;;  %v750_v61 = vrot.slane %v716_v25, 1 }
 0x29b   :  { %v731_v56 = vrot.slane %v552_v26, 7 }
 0x29d   :  { %v732_v62 = vsel %vm325_vm0, %v730_v53, %v731_v56 }
 0x29e   :  { %v743_v35 = vadd.f32 %v732_v62, %v635_v29 }
 0x2a1   :  { %v718_v38 = vpop.f32.mrf.mxu2 }
 0x2a2   :  { %v555_v47 = vpop.f32.mrf.mxu0  ;;  %v751_v40 = vrot.slane %v718_v38, 1  ;;  %v638_v31 = vpop.f32.mrf.mxu1 }
 0x2a3   :  { %v733_v63 = vrot.slane %v555_v47, 7 }
 0x2a4   :  { %v752_v32 = vsel %vm346_vm1, %v750_v61, %v751_v40  ;;  %v760_v34 = vsel %vm346_vm1, %v751_v40, 0.0 }
 0x2a5   :  { %v1573_v37 = vadd.f32 %v752_v32, %v742_v33  ;;  %v1575_v1 = vadd.f32 %v760_v34, %v743_v35  ;;  %v741_v2 = vsel %vm325_vm0, 0.0, %v733_v63 }
 0x2a6   :  { %v744_v48 = vadd.f32 %v741_v2, %v638_v31 }
 0x2a7   :  { %v775_v46 = vmul.f32 %v1573_v37, %v1573_v37  ;;  %v776_v44 = vmul.f32 %v1575_v1, %v1575_v1  ;;  %v766_v52 = vadd.f32 %v1575_v1, %v1573_v37 }
 0x2a9   :  { %v721_v45 = vpop.f32.mrf.mxu2  ;;  %v779_v57 = vadd.f32 %v776_v44, %v775_v46 }
 0x2aa   :  { %v557_v30 = vpop.f32.mrf.mxu0  ;;  %v753_v42 = vrot.slane %v721_v45, 1  ;;  %v640_v41 = vpop.f32.mrf.mxu1 }
 0x2ab   :  { %v734_v0 = vrot.slane %v557_v30, 7  ;;  %v833_v30 = vld [vmem:[%s1622_s6] sm:$0x1] }
 0x2ad   :  { %v735_v36 = vsel %vm325_vm0, %v733_v63, %v734_v0 }
 0x2ae   :  { %v745_v50 = vadd.f32 %v735_v36, %v640_v41 }
 0x2b1   :  { %v723_v39 = vpop.f32.mrf.mxu2 }
 0x2b2   :  { %v754_v43 = vrot.slane %v723_v39, 1 }
 0x2b4   :  { %v755_v49 = vsel %vm346_vm1, %v753_v42, %v754_v43  ;;  %v761_v51 = vsel %vm346_vm1, %v754_v43, 0.0 }
 0x2b5   :  { %v764_v54 = vadd.f32 %v755_v49, %v744_v48  ;;  %v765_v55 = vadd.f32 %v761_v51, %v745_v50 }
 0x2b7   :  { %v767_v59 = vadd.f32 %v766_v52, %v764_v54  ;;  %v777_v60 = vmul.f32 %v764_v54, %v764_v54  ;;  %v778_v4 = vmul.f32 %v765_v55, %v765_v55 }
 0x2b9   :  { %v768_v3 = vadd.f32 %v767_v59, %v765_v55  ;;  %v780_v5 = vadd.f32 %v779_v57, %v777_v60 }
 0x2bb   :  { %v769_v6 = vrot.slane %v768_v3, 4  ;;  %v781_v7 = vadd.f32 %v780_v5, %v778_v4 }
 0x2bd   :  { %v770_v8 = vadd.f32 %v769_v6, %v768_v3  ;;  %v782_v9 = vrot.slane %v781_v7, 4 }
 0x2bf   :  { %v771_v10 = vrot.slane %v770_v8, 2  ;;  %v783_v11 = vadd.f32 %v782_v9, %v781_v7 }
 0x2c1   :  { %v772_v14 = vadd.f32 %v771_v10, %v770_v8  ;;  %v784_v15 = vrot.slane %v783_v11, 2 }
 0x2c3   :  { %v773_v16 = vrot.slane %v772_v14, 1  ;;  %v785_v17 = vadd.f32 %v784_v15, %v783_v11 }
 0x2c5   :  { %v786_v18 = vrot.slane %v785_v17, 1  ;;  %v774_v19 = vadd.f32 %v773_v16, %v772_v14 }
 0x2c7   :  { %v787_v20 = vadd.f32 %v786_v18, %v785_v17 }
 0x2c9   :  { %v788_v21 = vsel %vm325_vm0, %v774_v19, %v787_v20 }
 0x2ca   :  { %805 = vmatmul.f32.vlgmr.msra.gmra.mxu3 %v788_v21 }
 0x34d   :  { %v806_v22 = vpop.f32.mrf.mxu3 }
 0x34e   :  { %v809_v12 = vmul.f32 0.001953125, %v806_v22 }
 0x350   :  { %v810_v13 = vmul.f32 %v809_v12, %v809_v12 }
 0x352   :  { %v812_v25 = vrot.slane %v810_v13, 7 }
 0x354   :  { %v814_v26 = vsub.f32 %v809_v12, %v812_v25 }
 0x356   :  { %v816_v29 = vadd.f32 1e-05, %v814_v26 }
 0x358   :  { %1172 = vrsqrt.f32 %v816_v29  ;;  %vm823_vm7 = vweird.f32 %v816_v29 }
 0x35e   :  { %v1173_v38 = vpop.eup %1172 }
 0x35f   :  { %v818_v47 = vmul.f32 %v1173_v38, %v816_v29  ;;  %vm824_vm6 = vweird.f32 %v1173_v38 }
 0x360   :  { %vm825_vm8 = vmor %vm823_vm7, %vm824_vm6 }
 0x361   :  { %v819_v53 = vmul.f32 %v1173_v38, %v818_v47 }
 0x363   :  { %v820_v56 = vmul.f32 0.5, %v819_v53 }
 0x365   :  { %v821_v40 = vsub.f32 1.5, %v820_v56 }
 0x367   :  { %v822_v31 = vmul.f32 %v1173_v38, %v821_v40 }
 0x369   :  { %v826_v45 = vsel %vm825_vm8, %v1173_v38, %v822_v31 }
 0x36a   :  { %828 = vst [vmem:[#allocation1] sm:$0xff] %v826_v45 }
 0x371   :  { %v830_v61 = vld [vmem:[#allocation1 + $0x1] ss:$9 sm:$0xff] }
 0x372   :  { %v832_v62 = vmul.f32 %v830_v61, %v815_v58 }
 0x374   :  { %v834_v32 = vmul.f32 %v832_v62, %v809_v12 }
 0x376   :  { %v835_v34 = vsub.f32 %v833_v30, %v834_v32 }
 0x378   :  { %v837_v63 = vperm.slane %v835_v34, 0 }
 0x37a   :  { %v839_v0 = vsel %vm325_vm0, %v832_v62, %v837_v63 }
 0x37b   :  { %1082 = vmatmul.msk.f32.vlgmr.msrb.gmra.mxu3 %vm437_vm5, %v839_v0 }
 0x3fe   :  { %v860_v33 = vpop.f32.mrf.mxu3 }
 0x3ff   :  { %v863_v35 = vperm.slane %v860_v33, 0  ;;  %v868_v2 = vperm.slane %v860_v33, 1 }
 0x401   :  { %v864_v36 = vmul.f32 %v863_v35, %v1573_v37  ;;  %v865_v39 = vmul.f32 %v863_v35, %v1575_v1  ;;  %v866_v42 = vmul.f32 %v863_v35, %v764_v54  ;;  %v867_v41 = vmul.f32 %v863_v35, %v765_v55 }
 0x403   :  { %v869_v43 = vadd.f32 %v868_v2, %v864_v36  ;;  %v870_v46 = vadd.f32 %v868_v2, %v865_v39  ;;  %v871_v44 = vadd.f32 %v868_v2, %v866_v42  ;;  %v872_v48 = vadd.f32 %v868_v2, %v867_v41 }
 0x405   :  { %v873_v50 = vadd.f32 %v869_v43, %v1296_v23  ;;  %v874_v49 = vadd.f32 %v870_v46, %v1301_v24  ;;  %v875_v51 = vadd.f32 %v871_v44, %v1311_v27  ;;  %v876_v52 = vadd.f32 %v872_v48, %v1316_v28 }
 0x407   :  { %v877_v57 = vmax.f32 %v873_v50, 0.0  ;;  %v878_v59 = vmax.f32 %v874_v49, 0.0  ;;  %v879_v60 = vmax.f32 %v875_v51, 0.0  ;;  %v880_v37 = vmax.f32 %v876_v52, 0.0 }
 0x409   :  { %881 = vst [vmem:[%s1623_s9] sm:$0xff] %v877_v57 }
 0x40a   :  { %882 = vst [vmem:[%s1623_s9 + $0x8] sm:$0xff] %v878_v59 }
 0x40b   :  { %883 = vst [vmem:[%s1623_s9 + $0x10] sm:$0xff] %v879_v60 }
 0x40c   :  { %884 = vst [vmem:[%s1623_s9 + $0x18] sm:$0xff] %v880_v37 }

</bundles_post_ra>
